<compile_context>
chip_gen: v7x
topology: tpu7x:2x2x1
jax: 0.10.0
libtpu: 0.0.40
codegen_flags: <defaults>
</compile_context>

<pallas_src>
import functools

import jax
import jax.numpy as jnp
from jax.experimental import pallas as pl
from jax.experimental.pallas import tpu as pltpu


# -----------------------------------------------------------------------------
# Positional table construction (glue, plain JAX -- mirrors __init__ exactly)
# -----------------------------------------------------------------------------
def build_positional_table(num_hiddens: int, max_token_len: int = 77) -> jnp.ndarray:
    # Same as the PyTorch original, this assumes an even num_hiddens.
    assert num_hiddens % 2 == 0, "num_hiddens must be even (matches PyTorch module)"
    P = jnp.zeros((1, max_token_len, num_hiddens), dtype=jnp.float32)
    tmp_col = jnp.arange(max_token_len, dtype=jnp.float32).reshape(-1, 1)
    tmp_row = jnp.power(
        10000.0, jnp.arange(0, num_hiddens, 2, dtype=jnp.float32) / num_hiddens
    )
    tmp_map = tmp_col / tmp_row  # (max_token_len, num_hiddens // 2)
    P = P.at[:, :, 0::2].set(jnp.sin(tmp_map))
    P = P.at[:, :, 1::2].set(jnp.cos(tmp_map))
    return P


# -----------------------------------------------------------------------------
# Kernel factory: out = dropout(X_block + P_block)
# -----------------------------------------------------------------------------
def _make_posenc_kernel(dropout_rate: float, training: bool):
    apply_dropout = training and dropout_rate > 0.0

    if apply_dropout:
        keep_scale = 1.0 / (1.0 - dropout_rate)
        # Integer threshold: P(bits < thr) == dropout_rate (to within 2**-32).
        thr = min(int(round(dropout_rate * 4294967296.0)), 4294967295)

        def kernel(x_ref, p_ref, m_ref, o_ref):
            # x_ref/m_ref/o_ref: (TILE_B, S*H); p_ref: (1, S*H) broadcast over rows.
            y = x_ref[...] + p_ref[...]
            keep = m_ref[...] >= jnp.uint32(thr)
            y = jnp.where(keep, y * jnp.asarray(keep_scale, y.dtype),
                          jnp.zeros_like(y))
            o_ref[...] = y.astype(o_ref.dtype)

        return kernel

    def kernel(x_ref, p_ref, o_ref):
        o_ref[...] = (x_ref[...] + p_ref[...]).astype(o_ref.dtype)

    return kernel


# -----------------------------------------------------------------------------
# Tiling helper: pick a row-block size that gives ~target-sized blocks while
# satisfying the (8, 128) block-shape rule (second-to-last dim multiple of 8
# or equal to the full extent; last dim is always the full S*H extent here).
# -----------------------------------------------------------------------------
def _choose_tile_rows(n_rows: int, row_bytes: int, target_bytes: int = 2 << 20) -> int:
    if n_rows * row_bytes <= target_bytes:
        return n_rows                      # whole tensor in a single block
    want = max(1, target_bytes // max(row_bytes, 1))
    if want >= n_rows or n_rows < 8:
        return n_rows
    return max((want // 8) * 8, 8)         # multiple of 8; edge blocks masked


# -----------------------------------------------------------------------------
# Wrapper (equivalent of PositionalEncoding.forward)
# -----------------------------------------------------------------------------
@functools.partial(jax.jit, static_argnames=("dropout_rate", "training"))
def positional_encoding_forward(x, P, key, *, dropout_rate: float, training: bool):
    B, S, H = x.shape
    width = S * H

    # Lane-dense 2-D layout: rows = batch, lanes = flattened (seq, hidden).
    x2 = x.reshape(B, width)
    p2 = P[:, :S, :].astype(x.dtype).reshape(1, width)

    tile_b = _choose_tile_rows(B, width * x2.dtype.itemsize)
    num_blocks = pl.cdiv(B, tile_b)
    apply_dropout = training and dropout_rate > 0.0

    in_specs = [
        pl.BlockSpec((tile_b, width), lambda i: (i, 0)),   # X rows
        # constant block index -> P is DMA'd once and stays resident
        pl.BlockSpec((1, width), lambda i: (0, 0)),        # P (shared)
    ]
    operands = [x2, p2]

    if apply_dropout:
        # Dropout bits generated with the portable JAX PRNG (works on TPU and
        # in interpret mode; pltpu.prng_* is not available in interpret mode).
        mask_bits = jax.random.bits(key, (B, width), dtype=jnp.uint32)
        in_specs.append(pl.BlockSpec((tile_b, width), lambda i: (i, 0)))
        operands.append(mask_bits)

    out2 = pl.pallas_call(
        _make_posenc_kernel(dropout_rate, training),
        out_shape=jax.ShapeDtypeStruct((B, width), x.dtype),
        grid=(num_blocks,),
        in_specs=in_specs,
        out_specs=pl.BlockSpec((tile_b, width), lambda i: (i, 0)),
        compiler_params=pltpu.CompilerParams(dimension_semantics=("parallel",)),
    )(*operands)

    return out2.reshape(B, S, H)


# -----------------------------------------------------------------------------
# Demo / self-check
# -----------------------------------------------------------------------------
if __name__ == "__main__":
    num_hiddens = 32
    max_token_len = 77
    dropout_rate = 0.1
    batch, seq = 2, 8

    key = jax.random.PRNGKey(0)
    x_key, drop_key = jax.random.split(key)
    x = jax.random.normal(x_key, (batch, seq, num_hiddens), dtype=jnp.float32)
    P = build_positional_table(num_hiddens, max_token_len)

    ref = x + P[:, :seq, :]

    # Eval mode (dropout is identity) -> must exactly match X + P[:, :S, :]
    out_eval = positional_encoding_forward(
        x, P, drop_key, dropout_rate=dropout_rate, training=False
    )
    jax.block_until_ready(out_eval)
    assert out_eval.shape == (batch, seq, num_hiddens)
    assert jnp.allclose(out_eval, ref, atol=1e-6), "eval-mode mismatch vs X + P"

    # Training mode: inverted dropout applied inside the kernel.
    # (Dropout RNG stream differs from PyTorch's; statistics, not values, match.)
    out_train = positional_encoding_forward(
        x, P, drop_key, dropout_rate=dropout_rate, training=True
    )
    jax.block_until_ready(out_train)
    assert out_train.shape == (batch, seq, num_hiddens)
    assert bool(jnp.all(jnp.isfinite(out_train)))
    # kept entries equal ref / keep_prob, dropped entries are exactly 0
    scaled_ref = ref / (1.0 - dropout_rate)
    ok = jnp.logical_or(
        jnp.isclose(out_train, scaled_ref, atol=1e-5), out_train == 0.0
    )
    assert bool(jnp.all(ok)), "training-mode dropout structure violated"

    print("KERNEL_OK")
</pallas_src>

<mosaic_0001>
module attributes {stable_mosaic.version = 11 : i64} {
  func.func @kernel(%arg0: i32, %arg1: memref<2x256xf32, #tpu.memory_space<vmem>>, %arg2: memref<1x256xf32, #tpu.memory_space<vmem>>, %arg3: memref<2x256xf32, #tpu.memory_space<vmem>>) attributes {dimension_semantics = [#tpu.dimension_semantics<parallel>], iteration_bounds = array<i64: 1>, scalar_prefetch = 0 : i64, scratch_operands = 0 : i64, tpu.core_type = #tpu.core_type<tc>, window_params = [{transform_indices = @transform_0, window_bounds = array<i64: 2, 256>}, {pipeline_mode = #tpu.pipeline_mode<synchronous>, transform_indices = @transform_1, window_bounds = array<i64: 1, 256>}, {transform_indices = @transform_2, window_bounds = array<i64: 2, 256>}]} {
    %c0 = arith.constant 0 : index
    %c0_0 = arith.constant 0 : index
    %0 = vector.load %arg1[%c0, %c0_0] : memref<2x256xf32, #tpu.memory_space<vmem>>, vector<2x256xf32>
    %c0_1 = arith.constant 0 : index
    %c0_2 = arith.constant 0 : index
    %1 = vector.load %arg2[%c0_1, %c0_2] : memref<1x256xf32, #tpu.memory_space<vmem>>, vector<1x256xf32>
    %2 = vector.broadcast %1 : vector<1x256xf32> to vector<2x256xf32>
    %3 = arith.addf %0, %2 : vector<2x256xf32>
    %c0_3 = arith.constant 0 : index
    %c0_4 = arith.constant 0 : index
    %4 = vector.load %arg3[%c0_3, %c0_4] : memref<2x256xf32, #tpu.memory_space<vmem>>, vector<2x256xf32>
    tpu.vector_store %arg3[%c0_3, %c0_4], %3 {strides = array<i32>} : memref<2x256xf32, #tpu.memory_space<vmem>>, vector<2x256xf32>,
    return
  }
  func.func @transform_0(%arg0: i32) -> (i32, i32) {
    %c0_i32 = arith.constant 0 : i32
    %c0_i32_0 = arith.constant 0 : i32
    return %arg0, %c0_i32 : i32, i32
  }
  func.func @transform_1(%arg0: i32) -> (i32, i32) {
    %c0_i32 = arith.constant 0 : i32
    %c0_i32_0 = arith.constant 0 : i32
    %c0_i32_1 = arith.constant 0 : i32
    return %c0_i32, %c0_i32_0 : i32, i32
  }
  func.func @transform_2(%arg0: i32) -> (i32, i32) {
    %c0_i32 = arith.constant 0 : i32
    %c0_i32_0 = arith.constant 0 : i32
    return %arg0, %c0_i32 : i32, i32
  }
}

</mosaic_0001>

<bundles_post_ra>
// kernel: positional_encoding_forward.1
= control target key start
LH: loop header
LB: loop body
LE: loop exit
PB: predicated region body
PF: predicated region fallthrough
CT: control target
= control target key end

     0   :  { %v14_v0 = vlaneseq  ;;  %v38_v1 = vmov 1983009808   ;;  %s63_s1 = inlined_call_operand.vmem [shape: f32[1,256], index: 1, kind: input, shape index: {}]   ;;  %s64_s0 = inlined_call_operand.vmem [shape: f32[2,256], index: 0, kind: input, shape index: {}]   ;;  %s65_s2 = inlined_call_operand.vmem [shape: f32[2,256], index: 2, kind: output, shape index: {}]  }
   0x1   :  { %v24_v2 = vunpack.c.l.s4 %v38_v1  ;;  %v12_v4 = vld [vmem:[%s63_s1] sm:$0x3] }
   0x2   :  { %v15_v3 = vshrl.u32 %v14_v0, 7  ;;  %v11_v12 = vld [vmem:[%s64_s0] sm:$0xf] }
   0x3   :  { %v25_v5 = vunpack.c.0.s8 %v24_v2 }
   0x4   :  { %v16_v6 = vsub.s32 0, %v15_v3  ;;  %v20_v7 = vsub.s32 1, %v15_v3 }
   0x5   :  { %v28_v10 = vsub.s32 %v25_v5, %v15_v3 }
   0x6   :  { %v17_v8 = vrot.slane %v12_v4, %v16_v6  ;;  %v21_v9 = vrot.slane %v12_v4, %v20_v7 }
   0x8   :  { %v22_v11 = vcombine.low %v17_v8, %v21_v9 }
   0xa   :  { %v29_v13 = vrot.slane %v22_v11, %v28_v10 }
   0xc   :  { %v31_v14 = vadd.f32 %v29_v13, %v11_v12 }
   0xe   :  { %32 = vst [vmem:[%s65_s2] sm:$0xf] %v31_v14 }

</bundles_post_ra>
